<compile_context>
chip_gen: v5e
topology: v5e:2x2
jax: 0.10.0
libtpu: 0.0.40
codegen_flags: <defaults>
</compile_context>

<pallas_src>
import jax
import jax.numpy as jnp
from jax.experimental import pallas as pl
from jax.experimental.pallas import tpu as pltpu

GAMMA = 2.0          # kernel hard-codes the gamma==2 fast path (square)
ALPHA = 0.25
IGNORE_INDEX = 255
LANE = 128
MAX_TILE = 2048      # lane-dense spatial tile; fits VMEM comfortably on v5e/v6e/v7x


def _focal_loss_kernel(pred_ref, target_ref, out_ref):
    """One (batch, spatial-tile) block: writes per-pixel channel-summed loss."""
    x = pred_ref[...].astype(jnp.float32)          # (1, C, T) raw logits
    labels = target_ref[...]                       # (1, 1, T) int32 labels

    # --- softmax over the channel axis (dim=1), as FocalLoss.forward does ---
    x_max = jnp.max(x, axis=1, keepdims=True)
    ex = jnp.exp(x - x_max)
    inv_den = 1.0 / jnp.sum(ex, axis=1, keepdims=True)   # one divide per pixel
    z = ex * inv_den                               # probs in [0, 1]

    # --- one-hot expansion with ignore_index handling (_expand_onehot_labels) ---
    cls = jax.lax.broadcasted_iota(jnp.int32, x.shape, 1)   # channel index
    valid = jnp.logical_and(labels >= 0, labels != IGNORE_INDEX)
    t = jnp.where(jnp.logical_and(cls == labels, valid), 1.0, 0.0)

    # --- binary_cross_entropy_with_logits(z, t), reduction='none' ---
    # z >= 0 always (softmax output), so max(z,0)==z and |z|==z; z*(1-t) == z - z*t
    # exactly for t in {0,1}.
    logpt = z * (1.0 - t) + jnp.log1p(jnp.exp(-z))

    # --- focal term (gamma == 2 -> square, no pow) + alpha balancing ---
    pt = jnp.exp(-logpt)
    focal_term = jnp.square(1.0 - pt)
    loss = focal_term * logpt * (ALPHA * t + (1.0 - ALPHA) * (1.0 - t))

    # per-pixel partial sums (channel-reduced); lane-dense store
    out_ref[...] = jnp.sum(loss, axis=1, keepdims=True)


def focal_loss(pred, target, loss_weight=1.0):
    """pred: (N, C, H, W) float logits (NCHW); target: (N, H, W) int labels."""
    N, C, H, W = pred.shape
    HW = H * W

    hw_aligned = ((HW + LANE - 1) // LANE) * LANE
    T = min(MAX_TILE, hw_aligned)                  # lane-dense, multiple of 128
    HW_pad = ((HW + T - 1) // T) * T
    num_tiles = HW_pad // T

    pred3 = pred.reshape(N, C, HW)                 # free view for contiguous NCHW
    tgt3 = target.astype(jnp.int32).reshape(N, 1, HW)
    if HW_pad != HW:
        pred3 = jnp.pad(pred3, ((0, 0), (0, 0), (0, HW_pad - HW)))
        tgt3 = jnp.pad(tgt3, ((0, 0), (0, 0), (0, HW_pad - HW)),
                       constant_values=IGNORE_INDEX)

    per_pixel = pl.pallas_call(
        _focal_loss_kernel,
        out_shape=jax.ShapeDtypeStruct((N, 1, HW_pad), jnp.float32),
        grid_spec=pltpu.PrefetchScalarGridSpec(
            num_scalar_prefetch=0,
            grid=(N, num_tiles),
            in_specs=[
                pl.BlockSpec((1, C, T), lambda n, t: (n, 0, t)),
                pl.BlockSpec((1, 1, T), lambda n, t: (n, 0, t)),
            ],
            out_specs=pl.BlockSpec((1, 1, T), lambda n, t: (n, 0, t)),
        ),
        compiler_params=pltpu.CompilerParams(
            dimension_semantics=("parallel", "parallel")),
    )(pred3, tgt3)

    # drop padded tail, finish the mean in plain JAX ('mean' over ALL N*C*H*W
    # elements, exactly as the PyTorch code does)
    total = jnp.sum(per_pixel[:, 0, :HW])
    return (loss_weight * total / float(N * C * H * W)).astype(jnp.float32)


def _reference_focal_loss(pred, target, loss_weight=1.0):
    """Pure-JAX reference mirroring the PyTorch code path."""
    probs = jax.nn.softmax(pred.astype(jnp.float32), axis=1)
    Ccls = pred.shape[1]
    lab = target[:, None, :, :]
    cls = jnp.arange(Ccls, dtype=jnp.int32)[None, :, None, None]
    valid = (lab >= 0) & (lab != IGNORE_INDEX)
    t = ((cls == lab) & valid).astype(jnp.float32)
    z = probs
    logpt = jnp.maximum(z, 0.0) - z * t + jnp.log1p(jnp.exp(-jnp.abs(z)))
    pt = jnp.exp(-logpt)
    loss = (1.0 - pt) ** GAMMA * logpt * (ALPHA * t + (1.0 - ALPHA) * (1.0 - t))
    return loss_weight * loss.mean()


if __name__ == "__main__":
    key = jax.random.PRNGKey(0)
    k_pred, k_tgt, k_ign = jax.random.split(key, 3)

    N, C, H, W = 2, 4, 16, 16
    pred = jax.random.normal(k_pred, (N, C, H, W), dtype=jnp.float32)
    target = jax.random.randint(k_tgt, (N, H, W), 0, C, dtype=jnp.int32)
    # sprinkle in some ignore_index pixels
    ignore_mask = jax.random.bernoulli(k_ign, 0.1, (N, H, W))
    target = jnp.where(ignore_mask, jnp.int32(IGNORE_INDEX), target)

    out = focal_loss(pred, target, loss_weight=1.0)
    out = jax.block_until_ready(out)

    ref = _reference_focal_loss(pred, target, loss_weight=1.0)
    assert jnp.allclose(out, ref, rtol=1e-5, atol=1e-6), (out, ref)

    print("KERNEL_OK")
</pallas_src>

<mosaic_0001>
module attributes {stable_mosaic.version = 11 : i64} {
  func.func @_focal_loss_kernel(%arg0: i32, %arg1: i32, %arg2: memref<1x4x256xf32, #tpu.memory_space<vmem>>, %arg3: memref<1x1x256xi32, #tpu.memory_space<vmem>>, %arg4: memref<1x1x256xf32, #tpu.memory_space<vmem>>) attributes {dimension_semantics = [#tpu.dimension_semantics<parallel>, #tpu.dimension_semantics<parallel>], iteration_bounds = array<i64: 2, 1>, scalar_prefetch = 0 : i64, scratch_operands = 0 : i64, tpu.core_type = #tpu.core_type<tc>, window_params = [{transform_indices = @transform_0, window_bounds = array<i64: 1, 4, 256>}, {transform_indices = @transform_1, window_bounds = array<i64: 1, 1, 256>}, {transform_indices = @transform_2, window_bounds = array<i64: 1, 1, 256>}]} {
    %c0 = arith.constant 0 : index
    %c0_0 = arith.constant 0 : index
    %c0_1 = arith.constant 0 : index
    %0 = vector.load %arg2[%c0, %c0_0, %c0_1] : memref<1x4x256xf32, #tpu.memory_space<vmem>>, vector<1x4x256xf32>
    %c0_2 = arith.constant 0 : index
    %c0_3 = arith.constant 0 : index
    %c0_4 = arith.constant 0 : index
    %1 = vector.load %arg3[%c0_2, %c0_3, %c0_4] : memref<1x1x256xi32, #tpu.memory_space<vmem>>, vector<1x1x256xi32>
    %cst = arith.constant dense<0xFF800000> : vector<1x256xf32>
    %2 = vector.multi_reduction <maximumf>, %0, %cst [1] : vector<1x4x256xf32> to vector<1x256xf32>
    %3 = vector.shape_cast %2 : vector<1x256xf32> to vector<1x1x256xf32>
    %4 = vector.broadcast %3 : vector<1x1x256xf32> to vector<1x4x256xf32>
    %5 = arith.subf %0, %4 : vector<1x4x256xf32>
    %6 = math.exp %5 : vector<1x4x256xf32>
    %cst_5 = arith.constant dense<0.000000e+00> : vector<1x256xf32>
    %7 = vector.multi_reduction <add>, %6, %cst_5 [1] : vector<1x4x256xf32> to vector<1x256xf32>
    %8 = vector.shape_cast %7 : vector<1x256xf32> to vector<1x1x256xf32>
    %cst_6 = arith.constant 1.000000e+00 : f32
    %9 = vector.broadcast %cst_6 : f32 to vector<1x1x256xf32>
    %10 = arith.divf %9, %8 : vector<1x1x256xf32>
    %11 = vector.broadcast %10 : vector<1x1x256xf32> to vector<1x4x256xf32>
    %12 = arith.mulf %6, %11 : vector<1x4x256xf32>
    %13 = tpu.iota {dimensions = array<i32: 1>} : vector<1x4x256xi32>
    %c0_i32 = arith.constant 0 : i32
    %14 = vector.broadcast %c0_i32 : i32 to vector<1x1x256xi32>
    %15 = arith.cmpi sge, %1, %14 : vector<1x1x256xi32>
    %c255_i32 = arith.constant 255 : i32
    %16 = vector.broadcast %c255_i32 : i32 to vector<1x1x256xi32>
    %17 = arith.cmpi ne, %1, %16 : vector<1x1x256xi32>
    %18 = arith.andi %15, %17 : vector<1x1x256xi1>
    %19 = vector.broadcast %1 : vector<1x1x256xi32> to vector<1x4x256xi32>
    %20 = arith.cmpi eq, %13, %19 : vector<1x4x256xi32>
    %21 = vector.broadcast %18 : vector<1x1x256xi1> to vector<1x4x256xi1>
    %22 = arith.andi %20, %21 : vector<1x4x256xi1>
    %cst_7 = arith.constant 1.000000e+00 : f32
    %cst_8 = arith.constant 0.000000e+00 : f32
    %23 = vector.broadcast %cst_7 : f32 to vector<1x4x256xf32>
    %24 = vector.broadcast %cst_8 : f32 to vector<1x4x256xf32>
    %25 = arith.select %22, %23, %24 : vector<1x4x256xi1>, vector<1x4x256xf32>
    %cst_9 = arith.constant 1.000000e+00 : f32
    %26 = vector.broadcast %cst_9 : f32 to vector<1x4x256xf32>
    %27 = arith.subf %26, %25 : vector<1x4x256xf32>
    %28 = arith.mulf %12, %27 : vector<1x4x256xf32>
    %cst_10 = arith.constant 0.000000e+00 : f32
    %29 = vector.broadcast %cst_10 : f32 to vector<1x4x256xf32>
    %30 = arith.subf %29, %12 : vector<1x4x256xf32>
    %31 = math.exp %30 : vector<1x4x256xf32>
    %32 = math.log1p %31 : vector<1x4x256xf32>
    %33 = arith.addf %28, %32 : vector<1x4x256xf32>
    %cst_11 = arith.constant 0.000000e+00 : f32
    %34 = vector.broadcast %cst_11 : f32 to vector<1x4x256xf32>
    %35 = arith.subf %34, %33 : vector<1x4x256xf32>
    %36 = math.exp %35 : vector<1x4x256xf32>
    %cst_12 = arith.constant 1.000000e+00 : f32
    %37 = vector.broadcast %cst_12 : f32 to vector<1x4x256xf32>
    %38 = arith.subf %37, %36 : vector<1x4x256xf32>
    %39 = arith.mulf %38, %38 : vector<1x4x256xf32>
    %40 = arith.mulf %39, %33 : vector<1x4x256xf32>
    %cst_13 = arith.constant 2.500000e-01 : f32
    %41 = vector.broadcast %cst_13 : f32 to vector<1x4x256xf32>
    %42 = arith.mulf %41, %25 : vector<1x4x256xf32>
    %cst_14 = arith.constant 1.000000e+00 : f32
    %43 = vector.broadcast %cst_14 : f32 to vector<1x4x256xf32>
    %44 = arith.subf %43, %25 : vector<1x4x256xf32>
    %cst_15 = arith.constant 7.500000e-01 : f32
    %45 = vector.broadcast %cst_15 : f32 to vector<1x4x256xf32>
    %46 = arith.mulf %45, %44 : vector<1x4x256xf32>
    %47 = arith.addf %42, %46 : vector<1x4x256xf32>
    %48 = arith.mulf %40, %47 : vector<1x4x256xf32>
    %cst_16 = arith.constant dense<0.000000e+00> : vector<1x256xf32>
    %49 = vector.multi_reduction <add>, %48, %cst_16 [1] : vector<1x4x256xf32> to vector<1x256xf32>
    %50 = vector.shape_cast %49 : vector<1x256xf32> to vector<1x1x256xf32>
    %c0_17 = arith.constant 0 : index
    %c0_18 = arith.constant 0 : index
    %c0_19 = arith.constant 0 : index
    %51 = vector.load %arg4[%c0_17, %c0_18, %c0_19] : memref<1x1x256xf32, #tpu.memory_space<vmem>>, vector<1x1x256xf32>
    tpu.vector_store %arg4[%c0_17, %c0_18, %c0_19], %50 {strides = array<i32>} : memref<1x1x256xf32, #tpu.memory_space<vmem>>, vector<1x1x256xf32>,
    return
  }
  func.func @transform_0(%arg0: i32, %arg1: i32) -> (i32, i32, i32) {
    %c0_i32 = arith.constant 0 : i32
    %c0_i32_0 = arith.constant 0 : i32
    return %arg0, %c0_i32, %arg1 : i32, i32, i32
  }
  func.func @transform_1(%arg0: i32, %arg1: i32) -> (i32, i32, i32) {
    %c0_i32 = arith.constant 0 : i32
    %c0_i32_0 = arith.constant 0 : i32
    return %arg0, %c0_i32, %arg1 : i32, i32, i32
  }
  func.func @transform_2(%arg0: i32, %arg1: i32) -> (i32, i32, i32) {
    %c0_i32 = arith.constant 0 : i32
    %c0_i32_0 = arith.constant 0 : i32
    return %arg0, %c0_i32, %arg1 : i32, i32, i32
  }
}

</mosaic_0001>

<bundles_post_ra>
// kernel: tpu_custom_call.1
= control target key start
LH: loop header
LB: loop body
LE: loop exit
PB: predicated region body
PF: predicated region fallthrough
CT: control target
= control target key end

     0   :  { %7 = vsyncpa [#allocation3], 0  ;;  %s954_s0 = inlined_call_operand.hbm [shape: f32[2,4,256], index: 0, kind: input, shape index: {}]   ;;  %s955_s1 = inlined_call_operand.hbm [shape: s32[2,1,256], index: 1, kind: input, shape index: {}]   ;;  %s956_s2 = inlined_call_operand.hbm [shape: f32[2,1,256], index: 2, kind: output, shape index: {}]  }
   0x1   :  { %9 = vsyncpa [#allocation3 + $0x1], 0 }
   0x2   :  { %10 = vsyncpa [#allocation6], 0 }
   0x3   :  { %12 = vsyncpa [#allocation6 + $0x1], 0 }
   0x4   :  { %13 = vsyncpa [#allocation4], 0 }
   0x5   :  { %15 = vsyncpa [#allocation4 + $0x1], 0  ;;  %s791_s9 = smov 0   ;;  %s793_s10 = smov 0  }
   0x6   :  { %s795_s11 = smov 0   ;;  %s797_s12 = smov 0  }
   0x7   :  { %s799_s13 = smov 0   ;;  %s801_s14 = smov 0  }
   0x8 LB: > { %s527_s15 = sadd.s32 4294967295, %s772_s14   ;;  %s528_s16 = sadd.s32 4294967294, %s772_s14   ;;  %s772_s14 = sphi %s801_s14, %s21_s14   ;;  %s768_s13 = sphi %s799_s13, %s968_s13   ;;  %s764_s12 = sphi %s797_s12, %s967_s12   ;;  %s760_s11 = sphi %s795_s11, %s966_s11   ;;  %s756_s10 = sphi %s793_s10, %s965_s10   ;;  %s752_s9 = sphi %s791_s9, %s964_s9  }
   0x9   : > { %s33_s17 = sadd.s32 1, %s768_s13  ;;  %s42_s18 = sadd.s32 1, %s760_s11 }
   0xa   : > { %p35_p0 = scmp.ge.s32.totalorder %s33_s17, 2  ;;  %p49_p1 = scmp.ne.s32.totalorder %s760_s11, %s756_s10 }
   0xb   : > { %p50_p2 = scmp.eq.s32.totalorder %s772_s14, 0  ;;  %p55_p3 = scmp.ne.s32.totalorder %s756_s10, %s752_s9 }
   0xc   : > { %s970_s17 = smov (%p35_p0, %s33_s17), 0  ;;  %p56_p5 = scmp.eq.s32.totalorder %s527_s15, 0 }
   0xd   : > { %p832_p4 = por %p50_p2, %p49_p1  ;;  %s37_s20 = ssub.s32 %s768_s13, %s970_s17 }
   0xe   : > { %p109_p6 = scmp.eq.s32.totalorder %s527_s15, 1  ;;  %p40_p7 = scmp.eq.s32.totalorder %s37_s20, 0 }
   0xf   : > { %p838_p8 = por %p56_p5, %p55_p3  ;;  %p115_p10 = scmp.eq.s32.totalorder %s528_s16, 1 }
  0x10   : > { %p842_p9 = por %p109_p6, %p49_p1  ;;  %p530_p12 = scmp.ge.s32.totalorder %s772_s14, 2 }
  0x11   : > { %s847_s23 = scalar_select %p40_p7, %s760_s11, %s42_s18  }
  0x12   : > { %p849_p11 = por %p115_p10, %p55_p3  ;;  %p562_p13 = scmp.lt.s32.totalorder %s772_s14, 2 }
  0x13   : > { %s135_s25 = sand.u32 1, %s760_s11   ;;  %s544_s27 = sshll.u32 %s768_s13, 3 }
  0x14   : > { %s531_s26 = sshll.u32 %s135_s25, 3  ;;  %s146_s30 = scalar_lea.hbm %s954_s0, %s544_s27 }
  0x15   : > { %s139_s3 = scalar_lea.vmem [#allocation2], %s531_s26  ;;  %s148_s5 = sshll.u32 %s146_s30, 4  ;;  %s149_s5 = int_to_ptr.hbm [resolvable:$true] %s148_s5 }
  0x16   : > { %s150_s4 = sshll.u32 %s139_s3, 4  ;;  %p862_p0 = pnand %p562_p13, %p832_p4  ;;  %s151_s4 = int_to_ptr.vmem [resolvable:$true] %s150_s4 }
  0x17   : > { %p536_p1 = scmp.ge.s32.totalorder %s772_s14, 1  ;;  %p176_p2 = scmp.lt.s32.totalorder %s772_s14, 3 }
  0x18   : > { %s136_s7 = scalar_lea.sflag [#allocation3], %s135_s25  ;;  %s534_s8 = sshll.u32 %s135_s25, 1 }
  0x19   : > { %554 = dma.hbm_to_vmem [thread:$0]  (!%p862_p0), %s149_s5, 128, %s151_s4, %s136_s7  }
  0x1a   : > { %p177_p3 = pnand %p536_p1, %p176_p2  ;;  %s535_s15 = sshll.u32 %s768_s13, 1 }
  0x1b   : > { %s167_s20 = scalar_lea.hbm %s955_s1, %s535_s15  ;;  %s161_s26 = scalar_lea.vmem [#allocation5], %s534_s8 }
  0x1c   : > { %s171_s19 = sshll.u32 %s161_s26, 4  ;;  %s169_s27 = sshll.u32 %s167_s20, 4  ;;  %s172_s19 = int_to_ptr.vmem [resolvable:$true] %s171_s19  ;;  %s170_s27 = int_to_ptr.hbm [resolvable:$true] %s169_s27 }
  0x1d   : > { %s158_s28 = scalar_lea.sflag [#allocation6], %s135_s25  ;;  %180 = sbr.rel (%p177_p3) target bundleno = 189 (0xbd), region = 28 }
  0x1e   : > { %557 = dma.hbm_to_vmem [thread:$0]  (!%p862_p0), %s170_s27, 32, %s172_s19, %s158_s28  }
  0x1f   : > { %s877_s29 = sand.u32 (!%p177_p3), 1, %s756_s10  }
  0x20   : > { %s537_s30 = sshll.u32 (!%p177_p3), %s877_s29, 3  ;;  %s183_s3 = scalar_lea.sflag (!%p177_p3), [#allocation3], %s877_s29 }
  0x21   : > { %s186_s4 = scalar_lea.vmem (!%p177_p3), [#allocation2], %s537_s30 }
  0x22   : > { %739 = dma.done.wait (%p838_p8), %s183_s3, 128  }
  0x23   : > { %741 = vsyncadd (%p838_p8), %s183_s3, 4294967168  ;;  %s538_s25 = sshll.u32 %s877_s29, 1  ;;  %s193_s5 = scalar_lea.sflag [#allocation6], %s877_s29 }
  0x24   : > { %s889_s6 = scalar_lea.vmem [#allocation5], %s538_s25 }
  0x25   : > { %743 = dma.done.wait (%p838_p8), %s193_s5, 32  }
  0x26   : > { %745 = vsyncadd (%p838_p8), %s193_s5, 4294967264  ;;  %v226_v0 = vld [vmem:[%s186_s4] sm:$0xff]  ;;  %vm234_vm0 = vcmask 1043456   ;;  %v227_v40 = vld [vmem:[%s889_s6] sm:$0x3]  ;;  %v313_v57 = vlaneseq  ;;  %v774_v60 = vmov 0  }
  0x27   : > { %229 = vst [vmem:[#allocation1] ss:$2 sm:$0xff] %v226_v0  ;;  %vm315_vm1 = vcmp.ge.s32.totalorder %v227_v40, 0  ;;  %vm316_vm2 = vcmp.ne.s32.totalorder %v227_v40, 255  ;;  %s541_s21 = sshll.u32 %s764_s12, 1  ;;  %s222_s16 = scalar_lea.vmem [#allocation7], %s538_s25 }
  0x28   : > { %vm317_vm6 = vmand %vm315_vm1, %vm316_vm2  ;;  %s414_s15 = scalar_lea.hbm %s956_s2, %s541_s21  ;;  %s416_s18 = sshll.u32 %s222_s16, 4  ;;  %s417_s18 = int_to_ptr.vmem [resolvable:$true] %s416_s18 }
  0x29   : > { %v322_v61 = vsel %vm317_vm6, 1, %v774_v60  ;;  %s418_s20 = sshll.u32 %s414_s15, 4  ;;  %s402_s12 = scalar_lea.sflag [#allocation4], %s877_s29  ;;  %s419_s20 = int_to_ptr.hbm [resolvable:$true] %s418_s20 }
  0x2a   : > { %s700_s26 = sshra.s32 %s419_s20, 4  ;;  %s706_s30 = scalar_lea.hbm %s956_s2, 4  ;;  %s701_s26 = int_to_ptr.hbm [resolvable:$true] %s700_s26 }
  0x2b   : > { %s702_s19 = scalar_lea.hbm %s701_s26, 2  ;;  %p707_p7 = scmp.lt.s32.totalorder %s701_s26, %s956_s2 }
  0x2c   : > { %p703_p4 = scmp.ne.s32.totalorder %s701_s26, %s702_s19  ;;  %p708_p8 = scmp.lt.s32.totalorder %s706_s30, %s702_s19 }
  0x2e   : > { %v230_v1 = vld.sshfl [vmem:[#allocation1] sm:$0xff pattern:$0x75316420]  ;;  %v231_v2 = vld.sshfl [vmem:[#allocation1 + $0x8] sm:$0xff pattern:$0x75316420]  ;;  %p704_p5 = pnand %p703_p4, %p842_p9  ;;  %p709_p10 = por %p708_p8, %p707_p7 }
  0x2f   : > { %v235_v3 = vsel %vm234_vm0, %v230_v1, -inf  ;;  %v242_v4 = vsel %vm234_vm0, %v231_v2, -inf  ;;  %v314_v1 = vshrl.u32 %v313_v57, 7  ;;  %v319_v2 = vperm.slane %v227_v40, 1 }
  0x30   : > { %v236_v5 = vrot.slane %v235_v3, 4  ;;  %v243_v6 = vrot.slane %v242_v4, 4  ;;  %p705_p6 = pneg %p704_p5 }
  0x31   : > { %vm321_vm12 = vcmp.eq.s32.totalorder %v314_v1, %v319_v2 }
  0x32   : > { %v237_v7 = vmax.f32 %v235_v3, %v236_v5  ;;  %v244_v8 = vmax.f32 %v242_v4, %v243_v6  ;;  %v324_v3 = vperm.slane %v322_v61, 1  ;;  %v318_v6 = vperm.slane %v227_v40, 0  ;;  %p710_p13 = pnand %p709_p10, %p705_p6 }
  0x34   : > { %v238_v9 = vrot.slane %v237_v7, 2  ;;  %v245_v10 = vrot.slane %v244_v8, 2  ;;  %vm326_vm13 = vcmp.eq.s32.totalorder %v324_v3, 1  ;;  %vm320_vm15 = vcmp.eq.s32.totalorder %v314_v1, %v318_v6 }
  0x35   : > { %vm328_vm14 = vmand %vm321_vm12, %vm326_vm13 }
  0x36   : > { %v239_v11 = vmax.f32 %v237_v7, %v238_v9  ;;  %v246_v12 = vmax.f32 %v244_v8, %v245_v10  ;;  %v323_v7 = vperm.slane %v322_v61, 0  ;;  %v775_v9 = vmov 0.0  }
  0x37   : > { %v330_v10 = vsel %vm328_vm14, 1.0, %v775_v9 }
  0x38   : > { %v240_v13 = vrot.slane %v239_v11, 1  ;;  %v247_v14 = vrot.slane %v246_v12, 1  ;;  %vm325_vm1 = vcmp.eq.s32.totalorder %v323_v7, 1 }
  0x39   : > { %vm327_vm2 = vmand %vm320_vm15, %vm325_vm1 }
  0x3a   : > { %v248_v15 = vmax.f32 %v246_v12, %v247_v14  ;;  %v241_v16 = vmax.f32 %v239_v11, %v240_v13  ;;  %v332_v12 = vsub.f32 1.0, %v330_v10  ;;  %v329_v13 = vsel %vm327_vm2, 1.0, %v775_v9 }
  0x3c   : > { %v251_v17 = vrot.slane %v248_v15, 4 }
  0x3e   : > { %v252_v18 = vsel %vm234_vm0, %v241_v16, %v251_v17  ;;  %v331_v16 = vsub.f32 1.0, %v329_v13  ;;  %v335_v17 = vrot.slane %v332_v12, 4 }
  0x3f   : > { %v254_v19 = vsub.f32 %v226_v0, %v252_v18 }
  0x41   : > { %v255_v20 = vmul.f32 1.442695, %v254_v19 }
  0x43   : > { %614 = vpow2.f32 %v255_v20  ;;  %v336_v20 = vsel %vm234_vm0, %v331_v16, %v335_v17 }
  0x49   : > { %v615_v21 = vpop.eup %614 }
  0x4a   : > { %258 = vst [vmem:[#allocation1] ss:$2 sm:$0xff] %v615_v21 }
  0x51   : > { %v259_v22 = vld.sshfl [vmem:[#allocation1] sm:$0xff pattern:$0x75316420]  ;;  %v260_v23 = vld.sshfl [vmem:[#allocation1 + $0x8] sm:$0xff pattern:$0x75316420] }
  0x52   : > { %v263_v24 = vsel %vm234_vm0, %v259_v22, 0.0  ;;  %v270_v25 = vsel %vm234_vm0, %v260_v23, 0.0 }
  0x53   : > { %v264_v26 = vrot.slane %v263_v24, 4  ;;  %v271_v27 = vrot.slane %v270_v25, 4 }
  0x55   : > { %v265_v28 = vadd.f32 %v264_v26, %v263_v24  ;;  %v272_v29 = vadd.f32 %v271_v27, %v270_v25 }
  0x57   : > { %v266_v30 = vrot.slane %v265_v28, 2  ;;  %v273_v31 = vrot.slane %v272_v29, 2 }
  0x59   : > { %v267_v32 = vadd.f32 %v266_v30, %v265_v28  ;;  %v274_v33 = vadd.f32 %v273_v31, %v272_v29  ;;  %v359_v29 = vmul.f32 0.25, %v330_v10  ;;  %v361_v30 = vmul.f32 0.75, %v332_v12 }
  0x5a   : > { %v358_v31 = vmul.f32 0.25, %v329_v13 }
  0x5b   : > { %v268_v34 = vrot.slane %v267_v32, 1  ;;  %v275_v35 = vrot.slane %v274_v33, 1 }
  0x5d   : > { %v269_v36 = vadd.f32 %v268_v34, %v267_v32  ;;  %v276_v37 = vadd.f32 %v275_v35, %v274_v33  ;;  %v360_v32 = vmul.f32 0.75, %v331_v16  ;;  %v363_v33 = vadd.f32 %v361_v30, %v359_v29 }
  0x5f   : > { %616 = vrcp.f32 %v269_v36  ;;  %v303_v46 = vand.u32 2147483648, %v276_v37  ;;  %v301_v48 = vand.u32 2147483647, %v276_v37  ;;  %vm282_vm5 = vweird.f32 %v269_v36 }
  0x60   : > { %618 = vrcp.f32 %v276_v37  ;;  %v288_v50 = vand.u32 2147483648, %v269_v36  ;;  %v286_v52 = vand.u32 2147483647, %v269_v36  ;;  %vm297_vm8 = vweird.f32 %v276_v37 }
  0x61   : > { %v304_v54 = vor.u32 1.1754944e-38, %v303_v46  ;;  %vm302_vm10 = vcmp.eq.f32.partialorder %v301_v48, 8.507059e+37  ;;  %v362_v35 = vadd.f32 %v360_v32, %v358_v31 }
  0x62   : > { %v289_v58 = vor.u32 1.1754944e-38, %v288_v50  ;;  %vm287_vm11 = vcmp.eq.f32.partialorder %v286_v52, 8.507059e+37 }
  0x65   : > { %v617_v38 = vpop.eup %616 }
  0x66   : > { %v619_v39 = vpop.eup %618  ;;  %v278_v41 = vmul.f32 %v617_v38, %v269_v36  ;;  %vm283_vm3 = vweird.f32 %v617_v38  ;;  %v366_v36 = vrot.slane %v363_v33, 4 }
  0x67   : > { %v293_v42 = vmul.f32 %v619_v39, %v276_v37  ;;  %vm298_vm4 = vweird.f32 %v619_v39  ;;  %vm901_vm7 = vmor %vm282_vm5, %vm283_vm3 }
  0x68   : > { %v279_v43 = vsub.f32 1.0, %v278_v41  ;;  %vm299_vm9 = vmor %vm297_vm8, %vm298_vm4  ;;  %vm398_vm4 = vcmp.lt.s32.totalorder %v313_v57, 256 }
  0x69   : > { %v294_v44 = vsub.f32 1.0, %v293_v42 }
  0x6a   : > { %v280_v45 = vmul.f32 %v617_v38, %v279_v43 }
  0x6b   : > { %v295_v47 = vmul.f32 %v619_v39, %v294_v44 }
  0x6c   : > { %v281_v49 = vadd.f32 %v617_v38, %v280_v45 }
  0x6d   : > { %v296_v53 = vadd.f32 %v619_v39, %v295_v47 }
  0x6e   : > { %v285_v55 = vsel %vm901_vm7, %v617_v38, %v281_v49 }
  0x6f   : > { %v300_v56 = vsel %vm299_vm9, %v619_v39, %v296_v53  ;;  %v290_v63 = vsel %vm287_vm11, %v289_v58, %v285_v55  ;;  %v367_v39 = vsel %vm234_vm0, %v362_v35, %v366_v36 }
  0x70   : > { %v305_v59 = vsel %vm302_vm10, %v304_v54, %v300_v56 }
  0x71   : > { %v309_v62 = vrot.slane %v305_v59, 4 }
  0x73   : > { %v310_v0 = vsel %vm234_vm0, %v290_v63, %v309_v62 }
  0x74   : > { %v312_v4 = vmul.f32 %v615_v21, %v310_v0 }
  0x76   : > { %v339_v5 = vsub.f32 0.0, %v312_v4  ;;  %v338_v24 = vmul.f32 %v336_v20, %v312_v4 }
  0x78   : > { %v340_v8 = vmul.f32 1.442695, %v339_v5 }
  0x7a   : > { %620 = vpow2.f32 %v340_v8 }
  0x80   : > { %v621_v11 = vpop.eup %620 }
  0x81   : > { %v342_v14 = vadd.f32 1.0, %v621_v11  ;;  %v345_v15 = vmul.f32 -0.5, %v621_v11  ;;  %v348_v19 = vand.u32 2147483647, %v621_v11 }
  0x83   : > { %622 = vlog2.f32 %v342_v14  ;;  %v346_v18 = vadd.f32 1.0, %v345_v15  ;;  %vm349_vm3 = vcmp.lt.f32.partialorder %v348_v19, 0.0004427343 }
  0x85   : > { %v347_v23 = vmul.f32 %v621_v11, %v346_v18 }
  0x89   : > { %v623_v21 = vpop.eup %622 }
  0x8a   : > { %v344_v22 = vmul.f32 0.6931472, %v623_v21 }
  0x8c   : > { %v350_v25 = vsel %vm349_vm3, %v347_v23, %v344_v22 }
  0x8d   : > { %v351_v26 = vadd.f32 %v350_v25, %v338_v24 }
  0x8f   : > { %v352_v27 = vsub.f32 0.0, %v351_v26 }
  0x91   : > { %v353_v28 = vmul.f32 1.442695, %v352_v27 }
  0x93   : > { %624 = vpow2.f32 %v353_v28 }
  0x99   : > { %v625_v34 = vpop.eup %624 }
  0x9a   : > { %v355_v37 = vsub.f32 1.0, %v625_v34 }
  0x9c   : > { %v356_v38 = vmul.f32 %v355_v37, %v355_v37 }
  0x9e   : > { %v357_v40 = vmul.f32 %v356_v38, %v351_v26 }
  0xa0   : > { %v369_v41 = vmul.f32 %v367_v39, %v357_v40 }
  0xa2   : > { %371 = vst [vmem:[#allocation1] ss:$2 sm:$0xff] %v369_v41 }
  0xa9   : > { %v372_v42 = vld.sshfl [vmem:[#allocation1] sm:$0xff pattern:$0x75316420]  ;;  %v373_v43 = vld.sshfl [vmem:[#allocation1 + $0x8] sm:$0xff pattern:$0x75316420] }
  0xaa   : > { %v376_v44 = vsel %vm234_vm0, %v372_v42, 0.0  ;;  %v383_v45 = vsel %vm234_vm0, %v373_v43, 0.0  ;;  %vm393_vm0 = vcmask 1040384  }
  0xab   : > { %v377_v46 = vrot.slane %v376_v44, 4  ;;  %v384_v47 = vrot.slane %v383_v45, 4 }
  0xad   : > { %v378_v48 = vadd.f32 %v377_v46, %v376_v44  ;;  %v385_v49 = vadd.f32 %v384_v47, %v383_v45 }
  0xaf   : > { %v379_v50 = vrot.slane %v378_v48, 2  ;;  %v386_v51 = vrot.slane %v385_v49, 2 }
  0xb1   : > { %v380_v52 = vadd.f32 %v379_v50, %v378_v48  ;;  %v387_v53 = vadd.f32 %v386_v51, %v385_v49 }
  0xb3   : > { %v381_v54 = vrot.slane %v380_v52, 1  ;;  %v388_v55 = vrot.slane %v387_v53, 1 }
  0xb5   : > { %v389_v56 = vadd.f32 %v388_v55, %v387_v53  ;;  %v382_v58 = vadd.f32 %v381_v54, %v380_v52 }
  0xb7   : > { %v392_v59 = vrot.slane %v389_v56, 7 }
  0xb9   : > { %v394_v60 = vsel %vm393_vm0, %v382_v58, %v392_v59 }
  0xba   : > { %400 = vst.msk [vmem:[%s222_s16] sm:$0x3] %vm398_vm4, %v394_v60 }
  0xbb   : > { %713 = shalt.err (!%p710_p13)
}
  0xbc   : > { %549 = dma.vmem_to_hbm [thread:$0]  (%p842_p9), %s417_s18, 32, %s419_s20, %s402_s12  }
  0xbd PF: > { %s430_s29 = sand.u32 1, %s752_s9   ;;  %p559_p0 = pnand %p530_p12, %p849_p11 }
  0xbe   : > { %s431_s25 = scalar_lea.sflag [#allocation4], %s430_s29 }
  0xbf   : > { %p560_p1 = pneg %p559_p0 }
  0xc1   : > { %747 = dma.done.wait (%p560_p1), %s431_s25, 32  }
  0xc2   : > { %749 = vsyncadd (%p560_p1), %s431_s25, 4294967264  ;;  %s21_s14 = sadd.s32 1, %s772_s14   ;;  %s964_s9 = smov %s756_s10 }
  0xc3   : > { %p18_p2 = scmp.ge.s32.totalorder %s21_s14, 4   ;;  %s965_s10 = smov %s760_s11 }
  0xc4   : > { %s966_s11 = smov %s847_s23  ;;  %s967_s12 = smov %s768_s13 }
  0xc5   : > { %s968_s13 = smov %s970_s17  ;;  %20 = sbr.rel (!%p18_p2) target bundleno = 8 (0x8), region = 86 }
  0xca   :  { %437 = vsyncpa [#allocation3], 1 }
  0xcb   :  { %439 = vsyncpa [#allocation3 + $0x1], 1 }
  0xcc   :  { %440 = vsyncpa [#allocation6], 1 }
  0xcd   :  { %442 = vsyncpa [#allocation6 + $0x1], 1 }
  0xce   :  { %443 = vsyncpa [#allocation4], 1 }
  0xcf   :  { %445 = vsyncpa [#allocation4 + $0x1], 1 }

</bundles_post_ra>
